<compile_context>
chip_gen: v7x
topology: tpu7x:2x2x1
jax: 0.10.0
libtpu: 0.0.40
codegen_flags: <defaults>
</compile_context>

<pallas_src>
import functools

import jax
import jax.numpy as jnp
from jax.experimental import pallas as pl
from jax.experimental.pallas import tpu as pltpu

LEAKY_SLOPE = 0.01   # PyTorch nn.LeakyReLU default
LN_EPS = 1e-5        # PyTorch nn.LayerNorm default
LANE = 128
SUBLANE = 8


def _round_up(a, b):
    return (a + b - 1) // b * b


def _vmem_budget_bytes():
    """Per-generation VMEM budget: physical capacity minus headroom.

    ~48 MiB on v7x (64 MiB physical), ~112 MiB on v5e/v6e (128 MiB physical).
    """
    try:
        cap = pltpu.get_tpu_info().vmem_capacity_bytes
    except Exception:
        cap = 64 * 1024 * 1024
    return int(max(32 * 1024 * 1024,
                   min(cap - 16 * 1024 * 1024, 112 * 1024 * 1024)))


def _num_tensorcores_per_chip():
    """2 on v7x (so the 'parallel' grid axis can be sharded), else 1."""
    try:
        kind = jax.devices()[0].device_kind.lower()
    except Exception:
        return 1
    return 2 if ("v7" in kind or "7x" in kind) else 1


def residual_block_kernel(
    x_ref,      # (tm, Dp)   input rows (padded feature lanes are zero)
    w1_ref,     # (Dp, Hp)   linear_1 weight, pre-transposed, zero-padded
    b1_ref,     # (1, Hp)
    g1_ref,     # (1, Dp)    layer_norm_1 gamma
    be1_ref,    # (1, Dp)    layer_norm_1 beta
    g2_ref,     # (1, Hp)    layer_norm_2 gamma
    be2_ref,    # (1, Hp)    layer_norm_2 beta
    w2_ref,     # (Hp, Dp)   linear_2 weight, pre-transposed, zero-padded
    b2_ref,     # (1, Dp)
    o_ref,      # (tm, Dp)
    *,
    input_dim,  # true (unpadded) feature dims — static
    hidden_dim,
):
    f32 = jnp.float32

    def layer_norm(v, gamma, beta, dim):
        # Padded lanes of `v` are exactly zero, so summing over the padded
        # lane axis and dividing by the true feature dim is exact.  The two
        # cross-lane reductions are independent (shorter XLU critical path);
        # clamp guards against E[x^2]-mean^2 rounding slightly negative.
        inv_dim = 1.0 / dim
        mean = jnp.sum(v, axis=-1, keepdims=True) * inv_dim
        mean_sq = jnp.sum(v * v, axis=-1, keepdims=True) * inv_dim
        var = jnp.maximum(mean_sq - mean * mean, 0.0)
        inv = jax.lax.rsqrt(var + LN_EPS)
        # Padded lanes: (0 - mean) * inv * gamma_pad(=0) + beta_pad(=0) == 0.
        return (v - mean) * inv * gamma + beta

    def leaky_relu(v):
        # slope < 1 => max(v, slope*v) == LeakyReLU(v); one mul + one max.
        return jnp.maximum(v, LEAKY_SLOPE * v)

    # LayerNorm_1 + LeakyReLU (the f32 copy of x is not kept live past here).
    h = layer_norm(x_ref[...].astype(f32),
                   g1_ref[...].astype(f32), be1_ref[...].astype(f32),
                   input_dim)
    h = leaky_relu(h)

    # Linear_1: feed the MXU operands in the weights' storage dtype (native
    # bf16 path when bf16 params are used); accumulate in f32.
    w1 = w1_ref[...]
    h = jnp.dot(h.astype(w1.dtype), w1, preferred_element_type=f32)
    h = h + b1_ref[...].astype(f32)

    # LayerNorm_2 + LeakyReLU
    h = layer_norm(h, g2_ref[...].astype(f32), be2_ref[...].astype(f32),
                   hidden_dim)
    h = leaky_relu(h)

    # Dropout: inference mode -> identity.
    # TODO(synk): training-mode dropout would use pltpu.prng_seed +
    # pltpu.stateful_bernoulli with a 1/(1-p) rescale.

    # Linear_2
    w2 = w2_ref[...]
    h = jnp.dot(h.astype(w2.dtype), w2, preferred_element_type=f32)
    h = h + b2_ref[...].astype(f32)

    # Residual add: re-read x from VMEM here (cheap vld) instead of holding
    # an f32 copy live across both matmuls.
    o_ref[...] = (h + x_ref[...].astype(f32)).astype(o_ref.dtype)


def _pad2(a, rows, cols):
    return jnp.pad(a, ((0, rows - a.shape[0]), (0, cols - a.shape[1])))


def prepare_params(params):
    """Pad/transpose parameters ONCE, outside the per-call path.

    `params` uses the torch shapes produced by init_params.  Returns
    (padded_params_dict, input_dim, hidden_dim).  gamma/beta padding is zero
    so the padded lanes stay exactly zero through the whole pipeline.
    """
    hidden_dim, input_dim = params["w1"].shape
    Dp = _round_up(input_dim, LANE)
    Hp = _round_up(hidden_dim, LANE)
    padded = {
        "w1_t": _pad2(params["w1"].T, Dp, Hp),               # (Dp, Hp)
        "b1": _pad2(params["b1"].reshape(1, -1), 1, Hp),
        "w2_t": _pad2(params["w2"].T, Hp, Dp),                # (Hp, Dp)
        "b2": _pad2(params["b2"].reshape(1, -1), 1, Dp),
        "gamma1": _pad2(params["gamma1"].reshape(1, -1), 1, Dp),
        "beta1": _pad2(params["beta1"].reshape(1, -1), 1, Dp),
        "gamma2": _pad2(params["gamma2"].reshape(1, -1), 1, Hp),
        "beta2": _pad2(params["beta2"].reshape(1, -1), 1, Hp),
    }
    padded = jax.tree_util.tree_map(jax.device_put, padded)
    return padded, input_dim, hidden_dim


@functools.partial(
    jax.jit,
    static_argnames=("hidden_dim", "tm", "single_buffer_params",
                     "vmem_limit_bytes", "num_tensorcores"))
def _residual_block_impl(x, padded, *, hidden_dim, tm, single_buffer_params,
                         vmem_limit_bytes, num_tensorcores):
    N, input_dim = x.shape
    Dp, Hp = padded["w1_t"].shape

    # Row tiling: big tiles amortize the ~0.35 us/step grid overhead.  The
    # half-batch cap (>=2 grid steps) only pays off on v7x's 2 TensorCores,
    # and only when each half is still a large tile.
    n8 = _round_up(N, SUBLANE)
    tm_req = tm
    if num_tensorcores >= 2 and (n8 // 2) >= 256:
        tm_req = min(tm_req, (n8 // 2) // SUBLANE * SUBLANE)
    tm_eff = max(SUBLANE, min(tm_req, n8) // SUBLANE * SUBLANE)
    Np = _round_up(n8, tm_eff)
    grid = (Np // tm_eff,)

    # Only the activation is padded per call (params are pre-padded).  When
    # N and input_dim are already aligned the zero-width pad is elided by XLA.
    xp = jnp.pad(x, ((0, Np - N), (0, Dp - input_dim)))

    row_spec = pl.BlockSpec((tm_eff, Dp), lambda i: (i, 0))
    # TODO(synk): if profiling at small Dp shows exposed DMA, sweep
    # pipeline_mode=pl.Buffered(3) on row_spec.

    if single_buffer_params:
        # Grid-invariant operands: constant index_map, so double-buffering
        # them only wastes VMEM.
        def const(shape):
            return pl.BlockSpec(shape, lambda i: (0, 0),
                                pipeline_mode=pl.Buffered(1))
    else:
        def const(shape):
            return pl.BlockSpec(shape, lambda i: (0, 0))

    out_padded = pl.pallas_call(
        functools.partial(residual_block_kernel,
                          input_dim=input_dim, hidden_dim=hidden_dim),
        out_shape=jax.ShapeDtypeStruct((Np, Dp), x.dtype),
        grid=grid,
        in_specs=[
            row_spec,           # x
            const((Dp, Hp)),    # w1_t
            const((1, Hp)),     # b1
            const((1, Dp)),     # gamma1
            const((1, Dp)),     # beta1
            const((1, Hp)),     # gamma2
            const((1, Hp)),     # beta2
            const((Hp, Dp)),    # w2_t
            const((1, Dp)),     # b2
        ],
        out_specs=row_spec,
        compiler_params=pltpu.CompilerParams(
            dimension_semantics=("parallel",),
            vmem_limit_bytes=vmem_limit_bytes,
        ),
    )(xp, padded["w1_t"], padded["b1"], padded["gamma1"], padded["beta1"],
      padded["gamma2"], padded["beta2"], padded["w2_t"], padded["b2"])

    return out_padded[:N, :input_dim]


def residual_block(x, padded_params, hidden_dim, *, tm=512,
                   single_buffer_params=True):
    """Fused ResidualBlockWithLayerNorm forward.

    x: (N, input_dim).  padded_params: output of prepare_params.  x and the
    weight matrices may be f32 or bf16 (bf16 halves HBM traffic and uses the
    native bf16 MXU path); LN statistics and matmul accumulation are f32.
    """
    return _residual_block_impl(
        x, padded_params, hidden_dim=hidden_dim, tm=tm,
        single_buffer_params=single_buffer_params,
        vmem_limit_bytes=_vmem_budget_bytes(),
        num_tensorcores=_num_tensorcores_per_chip())


def init_params(key, input_dim, hidden_dim):
    """Deterministic synthetic parameters matching the nn.Module shapes."""
    k1, k2, k3, k4 = jax.random.split(key, 4)
    # torch Linear weight shapes: (out, in).
    w1 = jax.random.normal(k1, (hidden_dim, input_dim), jnp.float32) * 0.05
    b1 = jax.random.normal(k2, (hidden_dim,), jnp.float32) * 0.05
    w2 = jax.random.normal(k3, (input_dim, hidden_dim), jnp.float32) * 0.05
    b2 = jax.random.normal(k4, (input_dim,), jnp.float32) * 0.05
    return {
        "w1": w1, "b1": b1, "w2": w2, "b2": b2,
        "gamma1": jnp.ones((input_dim,), jnp.float32),
        "beta1": jnp.zeros((input_dim,), jnp.float32),
        "gamma2": jnp.ones((hidden_dim,), jnp.float32),
        "beta2": jnp.zeros((hidden_dim,), jnp.float32),
    }


def reference_forward(x, params):
    """Pure-JAX reference implementing the same forward pass (f32)."""
    def ln(v, g, b):
        m = jnp.mean(v, axis=-1, keepdims=True)
        c = v - m
        var = jnp.mean(c * c, axis=-1, keepdims=True)
        return c * jax.lax.rsqrt(var + LN_EPS) * g + b

    def lrelu(v):
        return jnp.where(v >= 0, v, LEAKY_SLOPE * v)

    h = lrelu(ln(x, params["gamma1"], params["beta1"]))
    h = h @ params["w1"].T + params["b1"]
    h = lrelu(ln(h, params["gamma2"], params["beta2"]))
    h = h @ params["w2"].T + params["b2"]
    return h + x


if __name__ == "__main__":
    input_dim, hidden_dim = 32, 64
    N = 8  # batch rows

    key = jax.random.PRNGKey(0)
    kx, kp = jax.random.split(key)
    x = jax.random.normal(kx, (N, input_dim), jnp.float32)
    params = init_params(kp, input_dim, hidden_dim)

    padded, d_in, d_hid = prepare_params(params)

    def run(xi, pad):
        try:
            return jax.block_until_ready(residual_block(xi, pad, d_hid))
        except Exception:
            # Fallback if single-buffered params (pl.Buffered(1)) are not
            # supported by this jax/libtpu build.
            return jax.block_until_ready(
                residual_block(xi, pad, d_hid, single_buffer_params=False))

    # f32 path — tight check against the pure-JAX reference.
    out = run(x, padded)
    ref = reference_forward(x, params)
    assert out.shape == (N, input_dim)
    assert jnp.allclose(out, ref, atol=1e-4, rtol=1e-4), (
        f"max abs err {jnp.max(jnp.abs(out - ref))}"
    )

    # bf16 storage path: x and the weight matrices in bf16 (halves HBM bytes,
    # native bf16 MXU); LN params stay f32; accumulation stays f32.
    params_bf16 = dict(params,
                       w1=params["w1"].astype(jnp.bfloat16),
                       w2=params["w2"].astype(jnp.bfloat16))
    padded_b, _, _ = prepare_params(params_bf16)
    xb = x.astype(jnp.bfloat16)
    outb = run(xb, padded_b)
    refb = reference_forward(
        xb.astype(jnp.float32),
        {k: v.astype(jnp.float32) for k, v in params_bf16.items()})
    assert jnp.allclose(outb.astype(jnp.float32), refb, atol=5e-2, rtol=5e-2), (
        f"bf16 max abs err {jnp.max(jnp.abs(outb.astype(jnp.float32) - refb))}"
    )

    print("KERNEL_OK")
</pallas_src>

<mosaic_0001>
module attributes {stable_mosaic.version = 11 : i64} {
  func.func @residual_block_kernel(%arg0: i32, %arg1: memref<8x128xf32, #tpu.memory_space<vmem>>, %arg2: memref<128x128xf32, #tpu.memory_space<vmem>>, %arg3: memref<1x128xf32, #tpu.memory_space<vmem>>, %arg4: memref<1x128xf32, #tpu.memory_space<vmem>>, %arg5: memref<1x128xf32, #tpu.memory_space<vmem>>, %arg6: memref<1x128xf32, #tpu.memory_space<vmem>>, %arg7: memref<1x128xf32, #tpu.memory_space<vmem>>, %arg8: memref<128x128xf32, #tpu.memory_space<vmem>>, %arg9: memref<1x128xf32, #tpu.memory_space<vmem>>, %arg10: memref<8x128xf32, #tpu.memory_space<vmem>>) attributes {dimension_semantics = [#tpu.dimension_semantics<parallel>], iteration_bounds = array<i64: 1>, scalar_prefetch = 0 : i64, scratch_operands = 0 : i64, tpu.core_type = #tpu.core_type<tc>, window_params = [{transform_indices = @transform_0, window_bounds = array<i64: 8, 128>}, {pipeline_mode = #tpu.pipeline_mode<synchronous>, transform_indices = @transform_1, window_bounds = array<i64: 128, 128>}, {pipeline_mode = #tpu.pipeline_mode<synchronous>, transform_indices = @transform_2, window_bounds = array<i64: 1, 128>}, {pipeline_mode = #tpu.pipeline_mode<synchronous>, transform_indices = @transform_3, window_bounds = array<i64: 1, 128>}, {pipeline_mode = #tpu.pipeline_mode<synchronous>, transform_indices = @transform_4, window_bounds = array<i64: 1, 128>}, {pipeline_mode = #tpu.pipeline_mode<synchronous>, transform_indices = @transform_5, window_bounds = array<i64: 1, 128>}, {pipeline_mode = #tpu.pipeline_mode<synchronous>, transform_indices = @transform_6, window_bounds = array<i64: 1, 128>}, {pipeline_mode = #tpu.pipeline_mode<synchronous>, transform_indices = @transform_7, window_bounds = array<i64: 128, 128>}, {pipeline_mode = #tpu.pipeline_mode<synchronous>, transform_indices = @transform_8, window_bounds = array<i64: 1, 128>}, {transform_indices = @transform_9, window_bounds = array<i64: 8, 128>}]} {
    %c0 = arith.constant 0 : index
    %c0_0 = arith.constant 0 : index
    %0 = vector.load %arg1[%c0, %c0_0] : memref<8x128xf32, #tpu.memory_space<vmem>>, vector<8x128xf32>
    %c0_1 = arith.constant 0 : index
    %c0_2 = arith.constant 0 : index
    %1 = vector.load %arg4[%c0_1, %c0_2] : memref<1x128xf32, #tpu.memory_space<vmem>>, vector<1x128xf32>
    %c0_3 = arith.constant 0 : index
    %c0_4 = arith.constant 0 : index
    %2 = vector.load %arg5[%c0_3, %c0_4] : memref<1x128xf32, #tpu.memory_space<vmem>>, vector<1x128xf32>
    %cst = arith.constant dense<0.000000e+00> : vector<8xf32>
    %3 = vector.multi_reduction <add>, %0, %cst [1] : vector<8x128xf32> to vector<8xf32>
    %4 = vector.shape_cast %3 : vector<8xf32> to vector<8x1xf32>
    %cst_5 = arith.constant 3.125000e-02 : f32
    %5 = vector.broadcast %cst_5 : f32 to vector<8x1xf32>
    %6 = arith.mulf %4, %5 : vector<8x1xf32>
    %7 = arith.mulf %0, %0 : vector<8x128xf32>
    %cst_6 = arith.constant dense<0.000000e+00> : vector<8xf32>
    %8 = vector.multi_reduction <add>, %7, %cst_6 [1] : vector<8x128xf32> to vector<8xf32>
    %9 = vector.shape_cast %8 : vector<8xf32> to vector<8x1xf32>
    %cst_7 = arith.constant 3.125000e-02 : f32
    %10 = vector.broadcast %cst_7 : f32 to vector<8x1xf32>
    %11 = arith.mulf %9, %10 : vector<8x1xf32>
    %12 = arith.mulf %6, %6 : vector<8x1xf32>
    %13 = arith.subf %11, %12 : vector<8x1xf32>
    %cst_8 = arith.constant 0.000000e+00 : f32
    %14 = vector.broadcast %cst_8 : f32 to vector<8x1xf32>
    %15 = arith.maximumf %13, %14 : vector<8x1xf32>
    %cst_9 = arith.constant 9.99999974E-6 : f32
    %16 = vector.broadcast %cst_9 : f32 to vector<8x1xf32>
    %17 = arith.addf %15, %16 : vector<8x1xf32>
    %18 = math.rsqrt %17 : vector<8x1xf32>
    %19 = vector.broadcast %6 : vector<8x1xf32> to vector<8x128xf32>
    %20 = arith.subf %0, %19 : vector<8x128xf32>
    %21 = vector.broadcast %18 : vector<8x1xf32> to vector<8x128xf32>
    %22 = arith.mulf %20, %21 : vector<8x128xf32>
    %23 = vector.broadcast %1 : vector<1x128xf32> to vector<8x128xf32>
    %24 = arith.mulf %22, %23 : vector<8x128xf32>
    %25 = vector.broadcast %2 : vector<1x128xf32> to vector<8x128xf32>
    %26 = arith.addf %24, %25 : vector<8x128xf32>
    %cst_10 = arith.constant 0.00999999977 : f32
    %27 = vector.broadcast %cst_10 : f32 to vector<8x128xf32>
    %28 = arith.mulf %27, %26 : vector<8x128xf32>
    %29 = arith.maximumf %26, %28 : vector<8x128xf32>
    %c0_11 = arith.constant 0 : index
    %c0_12 = arith.constant 0 : index
    %30 = vector.load %arg2[%c0_11, %c0_12] : memref<128x128xf32, #tpu.memory_space<vmem>>, vector<128x128xf32>
    %cst_13 = arith.constant dense<0.000000e+00> : vector<8x128xf32>
    %31 = tpu.matmul %29, %30, %cst_13 {dimension_numbers = #tpu.dot_dimension_numbers<[1], [0], [0], [1], [0, 0, 1, 1], [], []>} : vector<8x128xf32>, vector<128x128xf32>, vector<8x128xf32> -> vector<8x128xf32>
    %c0_14 = arith.constant 0 : index
    %c0_15 = arith.constant 0 : index
    %32 = vector.load %arg3[%c0_14, %c0_15] : memref<1x128xf32, #tpu.memory_space<vmem>>, vector<1x128xf32>
    %33 = vector.broadcast %32 : vector<1x128xf32> to vector<8x128xf32>
    %34 = arith.addf %31, %33 : vector<8x128xf32>
    %c0_16 = arith.constant 0 : index
    %c0_17 = arith.constant 0 : index
    %35 = vector.load %arg6[%c0_16, %c0_17] : memref<1x128xf32, #tpu.memory_space<vmem>>, vector<1x128xf32>
    %c0_18 = arith.constant 0 : index
    %c0_19 = arith.constant 0 : index
    %36 = vector.load %arg7[%c0_18, %c0_19] : memref<1x128xf32, #tpu.memory_space<vmem>>, vector<1x128xf32>
    %cst_20 = arith.constant dense<0.000000e+00> : vector<8xf32>
    %37 = vector.multi_reduction <add>, %34, %cst_20 [1] : vector<8x128xf32> to vector<8xf32>
    %38 = vector.shape_cast %37 : vector<8xf32> to vector<8x1xf32>
    %cst_21 = arith.constant 1.562500e-02 : f32
    %39 = vector.broadcast %cst_21 : f32 to vector<8x1xf32>
    %40 = arith.mulf %38, %39 : vector<8x1xf32>
    %41 = arith.mulf %34, %34 : vector<8x128xf32>
    %cst_22 = arith.constant dense<0.000000e+00> : vector<8xf32>
    %42 = vector.multi_reduction <add>, %41, %cst_22 [1] : vector<8x128xf32> to vector<8xf32>
    %43 = vector.shape_cast %42 : vector<8xf32> to vector<8x1xf32>
    %cst_23 = arith.constant 1.562500e-02 : f32
    %44 = vector.broadcast %cst_23 : f32 to vector<8x1xf32>
    %45 = arith.mulf %43, %44 : vector<8x1xf32>
    %46 = arith.mulf %40, %40 : vector<8x1xf32>
    %47 = arith.subf %45, %46 : vector<8x1xf32>
    %cst_24 = arith.constant 0.000000e+00 : f32
    %48 = vector.broadcast %cst_24 : f32 to vector<8x1xf32>
    %49 = arith.maximumf %47, %48 : vector<8x1xf32>
    %cst_25 = arith.constant 9.99999974E-6 : f32
    %50 = vector.broadcast %cst_25 : f32 to vector<8x1xf32>
    %51 = arith.addf %49, %50 : vector<8x1xf32>
    %52 = math.rsqrt %51 : vector<8x1xf32>
    %53 = vector.broadcast %40 : vector<8x1xf32> to vector<8x128xf32>
    %54 = arith.subf %34, %53 : vector<8x128xf32>
    %55 = vector.broadcast %52 : vector<8x1xf32> to vector<8x128xf32>
    %56 = arith.mulf %54, %55 : vector<8x128xf32>
    %57 = vector.broadcast %35 : vector<1x128xf32> to vector<8x128xf32>
    %58 = arith.mulf %56, %57 : vector<8x128xf32>
    %59 = vector.broadcast %36 : vector<1x128xf32> to vector<8x128xf32>
    %60 = arith.addf %58, %59 : vector<8x128xf32>
    %cst_26 = arith.constant 0.00999999977 : f32
    %61 = vector.broadcast %cst_26 : f32 to vector<8x128xf32>
    %62 = arith.mulf %61, %60 : vector<8x128xf32>
    %63 = arith.maximumf %60, %62 : vector<8x128xf32>
    %c0_27 = arith.constant 0 : index
    %c0_28 = arith.constant 0 : index
    %64 = vector.load %arg8[%c0_27, %c0_28] : memref<128x128xf32, #tpu.memory_space<vmem>>, vector<128x128xf32>
    %cst_29 = arith.constant dense<0.000000e+00> : vector<8x128xf32>
    %65 = tpu.matmul %63, %64, %cst_29 {dimension_numbers = #tpu.dot_dimension_numbers<[1], [0], [0], [1], [0, 0, 1, 1], [], []>} : vector<8x128xf32>, vector<128x128xf32>, vector<8x128xf32> -> vector<8x128xf32>
    %c0_30 = arith.constant 0 : index
    %c0_31 = arith.constant 0 : index
    %66 = vector.load %arg9[%c0_30, %c0_31] : memref<1x128xf32, #tpu.memory_space<vmem>>, vector<1x128xf32>
    %67 = vector.broadcast %66 : vector<1x128xf32> to vector<8x128xf32>
    %68 = arith.addf %65, %67 : vector<8x128xf32>
    %c0_32 = arith.constant 0 : index
    %c0_33 = arith.constant 0 : index
    %69 = vector.load %arg1[%c0_32, %c0_33] : memref<8x128xf32, #tpu.memory_space<vmem>>, vector<8x128xf32>
    %70 = arith.addf %68, %69 : vector<8x128xf32>
    %c0_34 = arith.constant 0 : index
    %c0_35 = arith.constant 0 : index
    %71 = vector.load %arg10[%c0_34, %c0_35] : memref<8x128xf32, #tpu.memory_space<vmem>>, vector<8x128xf32>
    tpu.vector_store %arg10[%c0_34, %c0_35], %70 {strides = array<i32>} : memref<8x128xf32, #tpu.memory_space<vmem>>, vector<8x128xf32>,
    return
  }
  func.func @transform_0(%arg0: i32) -> (i32, i32) {
    %c0_i32 = arith.constant 0 : i32
    %c0_i32_0 = arith.constant 0 : i32
    return %arg0, %c0_i32 : i32, i32
  }
  func.func @transform_1(%arg0: i32) -> (i32, i32) {
    %c0_i32 = arith.constant 0 : i32
    %c0_i32_0 = arith.constant 0 : i32
    %c0_i32_1 = arith.constant 0 : i32
    return %c0_i32, %c0_i32_0 : i32, i32
  }
  func.func @transform_2(%arg0: i32) -> (i32, i32) {
    %c0_i32 = arith.constant 0 : i32
    %c0_i32_0 = arith.constant 0 : i32
    %c0_i32_1 = arith.constant 0 : i32
    return %c0_i32, %c0_i32_0 : i32, i32
  }
  func.func @transform_3(%arg0: i32) -> (i32, i32) {
    %c0_i32 = arith.constant 0 : i32
    %c0_i32_0 = arith.constant 0 : i32
    %c0_i32_1 = arith.constant 0 : i32
    return %c0_i32, %c0_i32_0 : i32, i32
  }
  func.func @transform_4(%arg0: i32) -> (i32, i32) {
    %c0_i32 = arith.constant 0 : i32
    %c0_i32_0 = arith.constant 0 : i32
    %c0_i32_1 = arith.constant 0 : i32
    return %c0_i32, %c0_i32_0 : i32, i32
  }
  func.func @transform_5(%arg0: i32) -> (i32, i32) {
    %c0_i32 = arith.constant 0 : i32
    %c0_i32_0 = arith.constant 0 : i32
    %c0_i32_1 = arith.constant 0 : i32
    return %c0_i32, %c0_i32_0 : i32, i32
  }
  func.func @transform_6(%arg0: i32) -> (i32, i32) {
    %c0_i32 = arith.constant 0 : i32
    %c0_i32_0 = arith.constant 0 : i32
    %c0_i32_1 = arith.constant 0 : i32
    return %c0_i32, %c0_i32_0 : i32, i32
  }
  func.func @transform_7(%arg0: i32) -> (i32, i32) {
    %c0_i32 = arith.constant 0 : i32
    %c0_i32_0 = arith.constant 0 : i32
    %c0_i32_1 = arith.constant 0 : i32
    return %c0_i32, %c0_i32_0 : i32, i32
  }
  func.func @transform_8(%arg0: i32) -> (i32, i32) {
    %c0_i32 = arith.constant 0 : i32
    %c0_i32_0 = arith.constant 0 : i32
    %c0_i32_1 = arith.constant 0 : i32
    return %c0_i32, %c0_i32_0 : i32, i32
  }
  func.func @transform_9(%arg0: i32) -> (i32, i32) {
    %c0_i32 = arith.constant 0 : i32
    %c0_i32_0 = arith.constant 0 : i32
    return %arg0, %c0_i32 : i32, i32
  }
}

module attributes {stable_mosaic.version = 11 : i64} {
  func.func @residual_block_kernel(%arg0: i32, %arg1: memref<8x128xf32, #tpu.memory_space<vmem>>, %arg2: memref<128x128xf32, #tpu.memory_space<vmem>>, %arg3: memref<1x128xf32, #tpu.memory_space<vmem>>, %arg4: memref<1x128xf32, #tpu.memory_space<vmem>>, %arg5: memref<1x128xf32, #tpu.memory_space<vmem>>, %arg6: memref<1x128xf32, #tpu.memory_space<vmem>>, %arg7: memref<1x128xf32, #tpu.memory_space<vmem>>, %arg8: memref<128x128xf32, #tpu.memory_space<vmem>>, %arg9: memref<1x128xf32, #tpu.memory_space<vmem>>, %arg10: memref<8x128xf32, #tpu.memory_space<vmem>>) attributes {dimension_semantics = [#tpu.dimension_semantics<parallel>], iteration_bounds = array<i64: 1>, scalar_prefetch = 0 : i64, scratch_operands = 0 : i64, tpu.core_type = #tpu.core_type<tc>, window_params = [{transform_indices = @transform_0, window_bounds = array<i64: 8, 128>}, {pipeline_mode = #tpu.pipeline_mode<synchronous>, transform_indices = @transform_1, window_bounds = array<i64: 128, 128>}, {pipeline_mode = #tpu.pipeline_mode<synchronous>, transform_indices = @transform_2, window_bounds = array<i64: 1, 128>}, {pipeline_mode = #tpu.pipeline_mode<synchronous>, transform_indices = @transform_3, window_bounds = array<i64: 1, 128>}, {pipeline_mode = #tpu.pipeline_mode<synchronous>, transform_indices = @transform_4, window_bounds = array<i64: 1, 128>}, {pipeline_mode = #tpu.pipeline_mode<synchronous>, transform_indices = @transform_5, window_bounds = array<i64: 1, 128>}, {pipeline_mode = #tpu.pipeline_mode<synchronous>, transform_indices = @transform_6, window_bounds = array<i64: 1, 128>}, {pipeline_mode = #tpu.pipeline_mode<synchronous>, transform_indices = @transform_7, window_bounds = array<i64: 128, 128>}, {pipeline_mode = #tpu.pipeline_mode<synchronous>, transform_indices = @transform_8, window_bounds = array<i64: 1, 128>}, {transform_indices = @transform_9, window_bounds = array<i64: 8, 128>}]} {
    %c0 = arith.constant 0 : index
    %c0_0 = arith.constant 0 : index
    %0 = vector.load %arg1[%c0, %c0_0] : memref<8x128xf32, #tpu.memory_space<vmem>>, vector<8x128xf32>
    %c0_1 = arith.constant 0 : index
    %c0_2 = arith.constant 0 : index
    %1 = vector.load %arg4[%c0_1, %c0_2] : memref<1x128xf32, #tpu.memory_space<vmem>>, vector<1x128xf32>
    %c0_3 = arith.constant 0 : index
    %c0_4 = arith.constant 0 : index
    %2 = vector.load %arg5[%c0_3, %c0_4] : memref<1x128xf32, #tpu.memory_space<vmem>>, vector<1x128xf32>
    %cst = arith.constant dense<0.000000e+00> : vector<8xf32>
    %3 = vector.multi_reduction <add>, %0, %cst [1] : vector<8x128xf32> to vector<8xf32>
    %4 = vector.shape_cast %3 : vector<8xf32> to vector<8x1xf32>
    %cst_5 = arith.constant 3.125000e-02 : f32
    %5 = vector.broadcast %cst_5 : f32 to vector<8x1xf32>
    %6 = arith.mulf %4, %5 : vector<8x1xf32>
    %7 = arith.mulf %0, %0 : vector<8x128xf32>
    %cst_6 = arith.constant dense<0.000000e+00> : vector<8xf32>
    %8 = vector.multi_reduction <add>, %7, %cst_6 [1] : vector<8x128xf32> to vector<8xf32>
    %9 = vector.shape_cast %8 : vector<8xf32> to vector<8x1xf32>
    %cst_7 = arith.constant 3.125000e-02 : f32
    %10 = vector.broadcast %cst_7 : f32 to vector<8x1xf32>
    %11 = arith.mulf %9, %10 : vector<8x1xf32>
    %12 = arith.mulf %6, %6 : vector<8x1xf32>
    %13 = arith.subf %11, %12 : vector<8x1xf32>
    %cst_8 = arith.constant 0.000000e+00 : f32
    %14 = vector.broadcast %cst_8 : f32 to vector<8x1xf32>
    %15 = arith.maximumf %13, %14 : vector<8x1xf32>
    %cst_9 = arith.constant 9.99999974E-6 : f32
    %16 = vector.broadcast %cst_9 : f32 to vector<8x1xf32>
    %17 = arith.addf %15, %16 : vector<8x1xf32>
    %18 = math.rsqrt %17 : vector<8x1xf32>
    %19 = vector.broadcast %6 : vector<8x1xf32> to vector<8x128xf32>
    %20 = arith.subf %0, %19 : vector<8x128xf32>
    %21 = vector.broadcast %18 : vector<8x1xf32> to vector<8x128xf32>
    %22 = arith.mulf %20, %21 : vector<8x128xf32>
    %23 = vector.broadcast %1 : vector<1x128xf32> to vector<8x128xf32>
    %24 = arith.mulf %22, %23 : vector<8x128xf32>
    %25 = vector.broadcast %2 : vector<1x128xf32> to vector<8x128xf32>
    %26 = arith.addf %24, %25 : vector<8x128xf32>
    %cst_10 = arith.constant 0.00999999977 : f32
    %27 = vector.broadcast %cst_10 : f32 to vector<8x128xf32>
    %28 = arith.mulf %27, %26 : vector<8x128xf32>
    %29 = arith.maximumf %26, %28 : vector<8x128xf32>
    %c0_11 = arith.constant 0 : index
    %c0_12 = arith.constant 0 : index
    %30 = vector.load %arg2[%c0_11, %c0_12] : memref<128x128xf32, #tpu.memory_space<vmem>>, vector<128x128xf32>
    %cst_13 = arith.constant dense<0.000000e+00> : vector<8x128xf32>
    %31 = tpu.matmul %29, %30, %cst_13 {dimension_numbers = #tpu.dot_dimension_numbers<[1], [0], [0], [1], [0, 0, 1, 1], [], []>} : vector<8x128xf32>, vector<128x128xf32>, vector<8x128xf32> -> vector<8x128xf32>
    %c0_14 = arith.constant 0 : index
    %c0_15 = arith.constant 0 : index
    %32 = vector.load %arg3[%c0_14, %c0_15] : memref<1x128xf32, #tpu.memory_space<vmem>>, vector<1x128xf32>
    %33 = vector.broadcast %32 : vector<1x128xf32> to vector<8x128xf32>
    %34 = arith.addf %31, %33 : vector<8x128xf32>
    %c0_16 = arith.constant 0 : index
    %c0_17 = arith.constant 0 : index
    %35 = vector.load %arg6[%c0_16, %c0_17] : memref<1x128xf32, #tpu.memory_space<vmem>>, vector<1x128xf32>
    %c0_18 = arith.constant 0 : index
    %c0_19 = arith.constant 0 : index
    %36 = vector.load %arg7[%c0_18, %c0_19] : memref<1x128xf32, #tpu.memory_space<vmem>>, vector<1x128xf32>
    %cst_20 = arith.constant dense<0.000000e+00> : vector<8xf32>
    %37 = vector.multi_reduction <add>, %34, %cst_20 [1] : vector<8x128xf32> to vector<8xf32>
    %38 = vector.shape_cast %37 : vector<8xf32> to vector<8x1xf32>
    %cst_21 = arith.constant 1.562500e-02 : f32
    %39 = vector.broadcast %cst_21 : f32 to vector<8x1xf32>
    %40 = arith.mulf %38, %39 : vector<8x1xf32>
    %41 = arith.mulf %34, %34 : vector<8x128xf32>
    %cst_22 = arith.constant dense<0.000000e+00> : vector<8xf32>
    %42 = vector.multi_reduction <add>, %41, %cst_22 [1] : vector<8x128xf32> to vector<8xf32>
    %43 = vector.shape_cast %42 : vector<8xf32> to vector<8x1xf32>
    %cst_23 = arith.constant 1.562500e-02 : f32
    %44 = vector.broadcast %cst_23 : f32 to vector<8x1xf32>
    %45 = arith.mulf %43, %44 : vector<8x1xf32>
    %46 = arith.mulf %40, %40 : vector<8x1xf32>
    %47 = arith.subf %45, %46 : vector<8x1xf32>
    %cst_24 = arith.constant 0.000000e+00 : f32
    %48 = vector.broadcast %cst_24 : f32 to vector<8x1xf32>
    %49 = arith.maximumf %47, %48 : vector<8x1xf32>
    %cst_25 = arith.constant 9.99999974E-6 : f32
    %50 = vector.broadcast %cst_25 : f32 to vector<8x1xf32>
    %51 = arith.addf %49, %50 : vector<8x1xf32>
    %52 = math.rsqrt %51 : vector<8x1xf32>
    %53 = vector.broadcast %40 : vector<8x1xf32> to vector<8x128xf32>
    %54 = arith.subf %34, %53 : vector<8x128xf32>
    %55 = vector.broadcast %52 : vector<8x1xf32> to vector<8x128xf32>
    %56 = arith.mulf %54, %55 : vector<8x128xf32>
    %57 = vector.broadcast %35 : vector<1x128xf32> to vector<8x128xf32>
    %58 = arith.mulf %56, %57 : vector<8x128xf32>
    %59 = vector.broadcast %36 : vector<1x128xf32> to vector<8x128xf32>
    %60 = arith.addf %58, %59 : vector<8x128xf32>
    %cst_26 = arith.constant 0.00999999977 : f32
    %61 = vector.broadcast %cst_26 : f32 to vector<8x128xf32>
    %62 = arith.mulf %61, %60 : vector<8x128xf32>
    %63 = arith.maximumf %60, %62 : vector<8x128xf32>
    %c0_27 = arith.constant 0 : index
    %c0_28 = arith.constant 0 : index
    %64 = vector.load %arg8[%c0_27, %c0_28] : memref<128x128xf32, #tpu.memory_space<vmem>>, vector<128x128xf32>
    %cst_29 = arith.constant dense<0.000000e+00> : vector<8x128xf32>
    %65 = tpu.matmul %63, %64, %cst_29 {dimension_numbers = #tpu.dot_dimension_numbers<[1], [0], [0], [1], [0, 0, 1, 1], [], []>} : vector<8x128xf32>, vector<128x128xf32>, vector<8x128xf32> -> vector<8x128xf32>
    %c0_30 = arith.constant 0 : index
    %c0_31 = arith.constant 0 : index
    %66 = vector.load %arg9[%c0_30, %c0_31] : memref<1x128xf32, #tpu.memory_space<vmem>>, vector<1x128xf32>
    %67 = vector.broadcast %66 : vector<1x128xf32> to vector<8x128xf32>
    %68 = arith.addf %65, %67 : vector<8x128xf32>
    %c0_32 = arith.constant 0 : index
    %c0_33 = arith.constant 0 : index
    %69 = vector.load %arg1[%c0_32, %c0_33] : memref<8x128xf32, #tpu.memory_space<vmem>>, vector<8x128xf32>
    %70 = arith.addf %68, %69 : vector<8x128xf32>
    %c0_34 = arith.constant 0 : index
    %c0_35 = arith.constant 0 : index
    %71 = vector.load %arg10[%c0_34, %c0_35] : memref<8x128xf32, #tpu.memory_space<vmem>>, vector<8x128xf32>
    tpu.vector_store %arg10[%c0_34, %c0_35], %70 {strides = array<i32>} : memref<8x128xf32, #tpu.memory_space<vmem>>, vector<8x128xf32>,
    return
  }
  func.func @transform_0(%arg0: i32) -> (i32, i32) {
    %c0_i32 = arith.constant 0 : i32
    %c0_i32_0 = arith.constant 0 : i32
    return %arg0, %c0_i32 : i32, i32
  }
  func.func @transform_1(%arg0: i32) -> (i32, i32) {
    %c0_i32 = arith.constant 0 : i32
    %c0_i32_0 = arith.constant 0 : i32
    %c0_i32_1 = arith.constant 0 : i32
    return %c0_i32, %c0_i32_0 : i32, i32
  }
  func.func @transform_2(%arg0: i32) -> (i32, i32) {
    %c0_i32 = arith.constant 0 : i32
    %c0_i32_0 = arith.constant 0 : i32
    %c0_i32_1 = arith.constant 0 : i32
    return %c0_i32, %c0_i32_0 : i32, i32
  }
  func.func @transform_3(%arg0: i32) -> (i32, i32) {
    %c0_i32 = arith.constant 0 : i32
    %c0_i32_0 = arith.constant 0 : i32
    %c0_i32_1 = arith.constant 0 : i32
    return %c0_i32, %c0_i32_0 : i32, i32
  }
  func.func @transform_4(%arg0: i32) -> (i32, i32) {
    %c0_i32 = arith.constant 0 : i32
    %c0_i32_0 = arith.constant 0 : i32
    %c0_i32_1 = arith.constant 0 : i32
    return %c0_i32, %c0_i32_0 : i32, i32
  }
  func.func @transform_5(%arg0: i32) -> (i32, i32) {
    %c0_i32 = arith.constant 0 : i32
    %c0_i32_0 = arith.constant 0 : i32
    %c0_i32_1 = arith.constant 0 : i32
    return %c0_i32, %c0_i32_0 : i32, i32
  }
  func.func @transform_6(%arg0: i32) -> (i32, i32) {
    %c0_i32 = arith.constant 0 : i32
    %c0_i32_0 = arith.constant 0 : i32
    %c0_i32_1 = arith.constant 0 : i32
    return %c0_i32, %c0_i32_0 : i32, i32
  }
  func.func @transform_7(%arg0: i32) -> (i32, i32) {
    %c0_i32 = arith.constant 0 : i32
    %c0_i32_0 = arith.constant 0 : i32
    %c0_i32_1 = arith.constant 0 : i32
    return %c0_i32, %c0_i32_0 : i32, i32
  }
  func.func @transform_8(%arg0: i32) -> (i32, i32) {
    %c0_i32 = arith.constant 0 : i32
    %c0_i32_0 = arith.constant 0 : i32
    %c0_i32_1 = arith.constant 0 : i32
    return %c0_i32, %c0_i32_0 : i32, i32
  }
  func.func @transform_9(%arg0: i32) -> (i32, i32) {
    %c0_i32 = arith.constant 0 : i32
    %c0_i32_0 = arith.constant 0 : i32
    return %arg0, %c0_i32 : i32, i32
  }
}

</mosaic_0001>

<bundles_post_ra>
// kernel: _residual_block_impl.1
= control target key start
LH: loop header
LB: loop body
LE: loop exit
PB: predicated region body
PF: predicated region fallthrough
CT: control target
= control target key end

     0   :  { %14 = vsyncpa [#allocation3], 0  ;;  %s710_s0 = inlined_call_operand.vmem [shape: f32[8,128], index: 0, kind: input, shape index: {}]   ;;  %s711_s1 = inlined_call_operand.hbm [shape: f32[128,128], index: 1, kind: input, shape index: {}]   ;;  %s712_s2 = inlined_call_operand.vmem [shape: f32[1,128], index: 2, kind: input, shape index: {}]   ;;  %s713_s3 = inlined_call_operand.vmem [shape: f32[1,128], index: 3, kind: input, shape index: {}]   ;;  %s714_s4 = inlined_call_operand.vmem [shape: f32[1,128], index: 4, kind: input, shape index: {}]   ;;  %s715_s5 = inlined_call_operand.vmem [shape: f32[1,128], index: 5, kind: input, shape index: {}]   ;;  %s716_s6 = inlined_call_operand.vmem [shape: f32[1,128], index: 6, kind: input, shape index: {}]   ;;  %s717_s7 = inlined_call_operand.hbm [shape: f32[128,128], index: 7, kind: input, shape index: {}]   ;;  %s718_s8 = inlined_call_operand.vmem [shape: f32[1,128], index: 8, kind: input, shape index: {}]   ;;  %s719_s9 = inlined_call_operand.hbm [shape: f32[8,128], index: 9, kind: output, shape index: {}]  }
   0x1   :  { %15 = vsyncpa [#allocation6], 0 }
   0x2   :  { %16 = vsyncpa [#allocation4], 0  ;;  %s572_s30 = smov [#allocation2]   ;;  %s500_s13 = scalar_lea.hbm %s711_s1, 2048 }
   0x3   :  { %s24_s10 = sshll.u32 %s572_s30, 4  ;;  %p501_p0 = scmp.ne.s32.totalorder %s711_s1, %s500_s13  ;;  %s25_s10 = int_to_ptr.vmem [resolvable:$true] %s24_s10 }
   0x4   :  { %p504_p1 = scmp.lt.u32.totalorder %s500_s13, %s711_s1 }
   0x6   :  { %p506_p2 = pnand %p504_p1, %p501_p0 }
   0x8   :  { %509 = shalt.err (!%p506_p2)
}
   0x9   :  { %s510_s18 = scalar_lea.vmem %s25_s10, 2048  ;;  %p515_p4 = scmp.lt.s32.totalorder %s25_s10, %s25_s10 }
   0xa   :  { %p511_p3 = scmp.ne.s32.totalorder %s25_s10, %s510_s18  ;;  %p516_p5 = scmp.lt.s32.totalorder %s510_s18, %s510_s18 }
   0xc   :  { %p517_p6 = por %p516_p5, %p515_p4 }
   0xe   :  { %p518_p7 = pnand %p517_p6, %p511_p3 }
  0x10   :  { %521 = shalt.err (!%p518_p7)
}
  0x11   :  { %s573_s19 = smov 128   ;;  %s574_s20 = smov 8  }
  0x12   :  { %30 = dma.hbm_to_vmem [thread:$0]  %s711_s1, 2048, %s25_s10, [#allocation3], %s573_s19, %s573_s19, %s574_s20  }
  0x13   :  { %s575_s23 = smov [#allocation5]   ;;  %s522_s27 = scalar_lea.hbm %s717_s7, 2048 }
  0x14   :  { %s46_s24 = sshll.u32 %s575_s23, 4  ;;  %p523_p8 = scmp.ne.s32.totalorder %s717_s7, %s522_s27  ;;  %s47_s24 = int_to_ptr.vmem [resolvable:$true] %s46_s24 }
  0x15   :  { %p526_p9 = scmp.lt.u32.totalorder %s522_s27, %s717_s7 }
  0x17   :  { %p528_p10 = pnand %p526_p9, %p523_p8 }
  0x19   :  { %531 = shalt.err (!%p528_p10)
}
  0x1a   :  { %s532_s12 = scalar_lea.vmem %s47_s24, 2048  ;;  %p537_p12 = scmp.lt.s32.totalorder %s47_s24, %s47_s24 }
  0x1b   :  { %p533_p11 = scmp.ne.s32.totalorder %s47_s24, %s532_s12  ;;  %p538_p13 = scmp.lt.s32.totalorder %s532_s12, %s532_s12 }
  0x1d   :  { %p539_p0 = por %p538_p13, %p537_p12 }
  0x1f   :  { %p540_p1 = pnand %p539_p0, %p533_p11 }
  0x21   :  { %543 = shalt.err (!%p540_p1)
}
  0x22   :  { %52 = dma.hbm_to_vmem [thread:$0]  %s717_s7, 2048, %s47_s24, [#allocation6], %s573_s19, %s573_s19, %s574_s20  }
  0x23   :  { %566 = dma.done.wait [#allocation3], 2048  }
  0x24   :  { %567 = vsyncadd [#allocation3], 4294965248 }
  0x25   :  { %568 = dma.done.wait [#allocation6], 2048  }
  0x26   :  { %569 = vsyncadd [#allocation6], 4294965248  ;;  %v657_v0 = vld [vmem:[%s710_s0] sm:$0xff]  ;;  %v95_v3 = vld [vmem:[#allocation2 + $0x8] sm:$0xff]  ;;  %v576_v5 = vmov 0.0|0.0   ;;  %vm577_vm0 = vmmov 0  }
  0x27   :  { %64 = vadd.xlane.f32.xlu0 %v657_v0  ;;  %v67_v1 = vmul.f32 %v657_v0, %v657_v0  ;;  %v94_v2 = vld [vmem:[#allocation2] sm:$0xff]  ;;  %440 = vmatprep.subr.bf16.mxu0 %v576_v5  ;;  %v96_v6 = vld [vmem:[#allocation2 + $0x10] sm:$0xff]  ;;  %v97_v7 = vld [vmem:[#allocation2 + $0x18] sm:$0xff]  ;;  %v578_v17 = vmov 0.0   ;;  %s579_s22 = smov [#allocation7]  }
  0x28   :  { %v441_v4 = vpack.c.bf16 %v95_v3, %v94_v2  ;;  %464 = vmatprep.subr.bf16.mxu1 %v576_v5  ;;  %v444_v8 = vpack.c.bf16 %v97_v7, %v96_v6  ;;  %v98_v9 = vld [vmem:[#allocation2 + $0x20] sm:$0xff]  ;;  %v99_v10 = vld [vmem:[#allocation2 + $0x28] sm:$0xff]  ;;  %v100_v12 = vld [vmem:[#allocation2 + $0x30] sm:$0xff]  ;;  %402 = vmatprep.mubr.msk.f32.mxu0 %vm577_vm0, %v578_v17  ;;  %s320_s23 = sshll.u32 %s579_s22, 4  ;;  %s321_s23 = int_to_ptr.vmem [resolvable:$true] %s320_s23 }
  0x29   :  { %v447_v11 = vpack.c.bf16 %v99_v10, %v98_v9  ;;  %v101_v13 = vld [vmem:[#allocation2 + $0x38] sm:$0xff]  ;;  %v102_v15 = vld [vmem:[#allocation2 + $0x40] sm:$0xff]  ;;  %v103_v16 = vld [vmem:[#allocation2 + $0x48] sm:$0xff]  ;;  %437 = vmatprep.mubr.msk.f32.mxu1 %vm577_vm0, %v578_v17  ;;  %p549_p3 = scmp.lt.s32.totalorder %s321_s23, %s321_s23 }
  0x2a   :  { %442 = vmatpush3.bf16.msra.mxu0 %v441_v4  ;;  %v450_v14 = vpack.c.bf16 %v101_v13, %v100_v12  ;;  %v453_v18 = vpack.c.bf16 %v103_v16, %v102_v15  ;;  %v104_v19 = vld [vmem:[#allocation2 + $0x50] sm:$0xff]  ;;  %v105_v20 = vld [vmem:[#allocation2 + $0x58] sm:$0xff]  ;;  %v106_v22 = vld [vmem:[#allocation2 + $0x60] sm:$0xff] }
  0x2b   :  { %68 = vadd.xlane.f32.xlu0 %v67_v1  ;;  %443 = vmatprep.subr.bf16.mxu0 %v576_v5  ;;  %v456_v21 = vpack.c.bf16 %v105_v20, %v104_v19  ;;  %v107_v23 = vld [vmem:[#allocation2 + $0x68] sm:$0xff]  ;;  %v108_v25 = vld [vmem:[#allocation2 + $0x70] sm:$0xff]  ;;  %v109_v26 = vld [vmem:[#allocation2 + $0x78] sm:$0xff] }
  0x2c   :  { %v459_v24 = vpack.c.bf16 %v107_v23, %v106_v22  ;;  %v462_v27 = vpack.c.bf16 %v109_v26, %v108_v25  ;;  %v330_v38 = vld [vmem:[%s713_s3] ss:$0 sm:$0xff]  ;;  %v220_v51 = vld [vmem:[#allocation5 + $0x8] sm:$0xff]  ;;  %v221_v53 = vld [vmem:[#allocation5 + $0x10] sm:$0xff] }
  0x2d   :  { %v331_v40 = vld [vmem:[%s714_s4] ss:$0 sm:$0xff]  ;;  %v222_v54 = vld [vmem:[#allocation5 + $0x18] sm:$0xff]  ;;  %v224_v57 = vld [vmem:[#allocation5 + $0x28] sm:$0xff] }
  0x2e   :  { %445 = vmatpush3.bf16.msra.mxu0 %v444_v8  ;;  %v332_v45 = vld [vmem:[%s712_s2] ss:$0 sm:$0xff]  ;;  %v468_v55 = vpack.c.bf16 %v222_v54, %v221_v53  ;;  %v225_v59 = vld [vmem:[#allocation5 + $0x30] sm:$0xff]  ;;  %v226_v60 = vld [vmem:[#allocation5 + $0x38] sm:$0xff] }
  0x2f   :  { %446 = vmatprep.subr.bf16.mxu0 %v576_v5  ;;  %v219_v50 = vld [vmem:[#allocation5] sm:$0xff]  ;;  %v474_v61 = vpack.c.bf16 %v226_v60, %v225_v59  ;;  %v228_v63 = vld [vmem:[#allocation5 + $0x48] sm:$0xff]  ;;  %v229_v2 = vld [vmem:[#allocation5 + $0x50] sm:$0xff] }
  0x30   :  { %v465_v52 = vpack.c.bf16 %v220_v51, %v219_v50  ;;  %v223_v56 = vld [vmem:[#allocation5 + $0x20] sm:$0xff]  ;;  %v230_v3 = vld [vmem:[#allocation5 + $0x58] sm:$0xff]  ;;  %v232_v7 = vld [vmem:[#allocation5 + $0x68] sm:$0xff] }
  0x31   :  { %v471_v58 = vpack.c.bf16 %v224_v57, %v223_v56  ;;  %v227_v62 = vld [vmem:[#allocation5 + $0x40] sm:$0xff]  ;;  %v480_v4 = vpack.c.bf16 %v230_v3, %v229_v2  ;;  %v233_v9 = vld [vmem:[#allocation5 + $0x70] sm:$0xff]  ;;  %v234_v10 = vld [vmem:[#allocation5 + $0x78] sm:$0xff] }
  0x32   :  { %448 = vmatpush3.bf16.msra.mxu0 %v447_v11  ;;  %466 = vmatpush3.bf16.msra.mxu1 %v465_v52  ;;  %v477_v1 = vpack.c.bf16 %v228_v63, %v227_v62  ;;  %v231_v6 = vld [vmem:[#allocation5 + $0x60] sm:$0xff]  ;;  %v486_v11 = vpack.c.bf16 %v234_v10, %v233_v9 }
  0x33   :  { %449 = vmatprep.subr.bf16.mxu0 %v576_v5  ;;  %467 = vmatprep.subr.bf16.mxu1 %v576_v5  ;;  %v483_v8 = vpack.c.bf16 %v232_v7, %v231_v6  ;;  %v333_v22 = vld [vmem:[%s715_s5] ss:$0 sm:$0xff]  ;;  %s544_s5 = scalar_lea.vmem %s321_s23, 128 }
  0x34   :  { %p545_p2 = scmp.ne.s32.totalorder %s321_s23, %s544_s5  ;;  %p550_p4 = scmp.lt.s32.totalorder %s544_s5, %s544_s5 }
  0x36   :  { %451 = vmatpush3.bf16.msra.mxu0 %v450_v14  ;;  %469 = vmatpush3.bf16.msra.mxu1 %v468_v55  ;;  %p551_p5 = por %p550_p4, %p549_p3 }
  0x37   :  { %452 = vmatprep.subr.bf16.mxu0 %v576_v5  ;;  %470 = vmatprep.subr.bf16.mxu1 %v576_v5 }
  0x38   :  { %p552_p6 = pnand %p551_p5, %p545_p2 }
  0x3a   :  { %454 = vmatpush3.bf16.msra.mxu0 %v453_v18  ;;  %472 = vmatpush3.bf16.msra.mxu1 %v471_v58 }
  0x3b   :  { %455 = vmatprep.subr.bf16.mxu0 %v576_v5  ;;  %473 = vmatprep.subr.bf16.mxu1 %v576_v5 }
  0x3e   :  { %457 = vmatpush3.bf16.msra.mxu0 %v456_v21  ;;  %475 = vmatpush3.bf16.msra.mxu1 %v474_v61 }
  0x3f   :  { %458 = vmatprep.subr.bf16.mxu0 %v576_v5  ;;  %476 = vmatprep.subr.bf16.mxu1 %v576_v5 }
  0x42   :  { %460 = vmatpush3.bf16.msra.mxu0 %v459_v24  ;;  %478 = vmatpush3.bf16.msra.mxu1 %v477_v1 }
  0x43   :  { %461 = vmatprep.subr.bf16.mxu0 %v576_v5  ;;  %479 = vmatprep.subr.bf16.mxu1 %v576_v5 }
  0x46   :  { %463 = vmatpush3.bf16.msra.mxu0 %v462_v27  ;;  %481 = vmatpush3.bf16.msra.mxu1 %v480_v4 }
  0x47   :  { %482 = vmatprep.subr.bf16.mxu1 %v576_v5 }
  0x4a   :  { %484 = vmatpush3.bf16.msra.mxu1 %v483_v8 }
  0x4b   :  { %485 = vmatprep.subr.bf16.mxu1 %v576_v5  ;;  %v334_v5 = vld [vmem:[%s716_s6] ss:$0 sm:$0xff] }
  0x4e   :  { %487 = vmatpush3.bf16.msra.mxu1 %v486_v11 }
  0xb4   :  { %v65_v28 = vpop.xlane.xlu0 %64 }
  0xb5   :  { %v66_v29 = vmul.f32 0.03125, %v65_v28  ;;  %v335_v28 = vld [vmem:[%s718_s8] ss:$0 sm:$0xff] }
  0xb7   :  { %v71_v31 = vmul.f32 %v66_v29, %v66_v29  ;;  %v76_v36 = vsub.f32 %v657_v0, %v66_v29 }
  0xb8   :  { %v69_v30 = vpop.xlane.xlu0 %68 }
  0xb9   :  { %v70_v32 = vmul.f32 0.03125, %v69_v30 }
  0xbb   :  { %v72_v33 = vsub.f32 %v70_v32, %v71_v31 }
  0xbd   :  { %v73_v34 = vmax.f32 %v72_v33, 0.0 }
  0xbf   :  { %v74_v35 = vadd.f32 1e-05, %v73_v34 }
  0xc1   :  { %496 = vrsqrt.f32 %v74_v35 }
  0xcb   :  { %v497_v37 = vpop.eup %496 }
  0xcc   :  { %v77_v39 = vmul.f32 %v497_v37, %v76_v36 }
  0xce   :  { %v84_v41 = vmul.f32 %v330_v38, %v77_v39 }
  0xd0   :  { %v91_v42 = vadd.f32 %v331_v40, %v84_v41 }
  0xd2   :  { %v92_v43 = vmul.f32 0.01, %v91_v42 }
  0xd4   :  { %v93_v44 = vmax.f32 %v91_v42, %v92_v43 }
  0xd6   :  { %403 = vmatmul.mubr.f32.vlgmr.msra.gmra.mrb[0].mxu0 %v93_v44 }
 0x1a9   :  { %v183_v46 = vpop.f32.mrb[0].mxu0 }
 0x1aa   :  { %v184_v47 = vadd.f32 %v332_v45, %v183_v46  ;;  %v404_v48 = vpop.f32.mrb[1].mxu0 }
 0x1ac   :  { %189 = vadd.xlane.f32.xlu1 %v184_v47  ;;  %v192_v49 = vmul.f32 %v184_v47, %v184_v47 }
 0x1b0   :  { %193 = vadd.xlane.f32.xlu1 %v192_v49 }
 0x239   :  { %v190_v12 = vpop.xlane.xlu1 %189 }
 0x23a   :  { %v191_v13 = vmul.f32 0.015625, %v190_v12 }
 0x23c   :  { %v196_v15 = vmul.f32 %v191_v13, %v191_v13  ;;  %v201_v20 = vsub.f32 %v184_v47, %v191_v13 }
 0x23d   :  { %v194_v14 = vpop.xlane.xlu1 %193 }
 0x23e   :  { %v195_v16 = vmul.f32 0.015625, %v194_v14 }
 0x240   :  { %v197_v17 = vsub.f32 %v195_v16, %v196_v15 }
 0x242   :  { %v198_v18 = vmax.f32 %v197_v17, 0.0 }
 0x244   :  { %v199_v19 = vadd.f32 1e-05, %v198_v18 }
 0x246   :  { %498 = vrsqrt.f32 %v199_v19 }
 0x250   :  { %v499_v21 = vpop.eup %498 }
 0x251   :  { %v202_v23 = vmul.f32 %v499_v21, %v201_v20 }
 0x253   :  { %v209_v24 = vmul.f32 %v333_v22, %v202_v23 }
 0x255   :  { %v216_v25 = vadd.f32 %v334_v5, %v209_v24 }
 0x257   :  { %v217_v26 = vmul.f32 0.01, %v216_v25 }
 0x259   :  { %v218_v27 = vmax.f32 %v216_v25, %v217_v26 }
 0x25b   :  { %438 = vmatmul.mubr.f32.vlgmr.msra.gmra.mrb[0].mxu1 %v218_v27 }
 0x32e   :  { %v308_v29 = vpop.f32.mrb[0].mxu1 }
 0x32f   :  { %v309_v30 = vadd.f32 %v335_v28, %v308_v29  ;;  %v439_v31 = vpop.f32.mrb[1].mxu1 }
 0x331   :  { %v312_v32 = vadd.f32 %v309_v30, %v657_v0 }
 0x333   :  { %313 = vst [vmem:[#allocation7] sm:$0xff] %v312_v32 }
 0x334   :  { %555 = shalt.err (!%p552_p6)
}
 0x335   :  { %s556_s8 = scalar_lea.hbm %s719_s9, 128 }
 0x336   :  { %p557_p7 = scmp.ne.s32.totalorder %s719_s9, %s556_s8  ;;  %p560_p8 = scmp.lt.u32.totalorder %s556_s8, %s719_s9 }
 0x338   :  { %p562_p9 = pnand %p560_p8, %p557_p7 }
 0x33a   :  { %565 = shalt.err (!%p562_p9)
}
 0x33b   :  { %323 = dma.vmem_to_hbm [thread:$0]  %s321_s23, 128, %s719_s9, [#allocation4]  }
 0x33c   :  { %570 = dma.done.wait [#allocation4], 128  }
 0x33d   :  { %571 = vsyncadd [#allocation4], 4294967168 }
 0x33e   :  { %327 = vsyncpa [#allocation3], 1 }
 0x33f   :  { %328 = vsyncpa [#allocation6], 1 }
 0x340   :  { %329 = vsyncpa [#allocation4], 1 }

// kernel: _residual_block_impl.1
= control target key start
LH: loop header
LB: loop body
LE: loop exit
PB: predicated region body
PF: predicated region fallthrough
CT: control target
= control target key end

     0   :  { %14 = vsyncpa [#allocation3], 0  ;;  %s710_s0 = inlined_call_operand.vmem [shape: f32[8,128], index: 0, kind: input, shape index: {}]   ;;  %s711_s1 = inlined_call_operand.hbm [shape: f32[128,128], index: 1, kind: input, shape index: {}]   ;;  %s712_s2 = inlined_call_operand.vmem [shape: f32[1,128], index: 2, kind: input, shape index: {}]   ;;  %s713_s3 = inlined_call_operand.vmem [shape: f32[1,128], index: 3, kind: input, shape index: {}]   ;;  %s714_s4 = inlined_call_operand.vmem [shape: f32[1,128], index: 4, kind: input, shape index: {}]   ;;  %s715_s5 = inlined_call_operand.vmem [shape: f32[1,128], index: 5, kind: input, shape index: {}]   ;;  %s716_s6 = inlined_call_operand.vmem [shape: f32[1,128], index: 6, kind: input, shape index: {}]   ;;  %s717_s7 = inlined_call_operand.hbm [shape: f32[128,128], index: 7, kind: input, shape index: {}]   ;;  %s718_s8 = inlined_call_operand.vmem [shape: f32[1,128], index: 8, kind: input, shape index: {}]   ;;  %s719_s9 = inlined_call_operand.hbm [shape: f32[8,128], index: 9, kind: output, shape index: {}]  }
   0x1   :  { %15 = vsyncpa [#allocation6], 0 }
   0x2   :  { %16 = vsyncpa [#allocation4], 0  ;;  %s572_s30 = smov [#allocation2]   ;;  %s500_s13 = scalar_lea.hbm %s711_s1, 2048 }
   0x3   :  { %s24_s10 = sshll.u32 %s572_s30, 4  ;;  %p501_p0 = scmp.ne.s32.totalorder %s711_s1, %s500_s13  ;;  %s25_s10 = int_to_ptr.vmem [resolvable:$true] %s24_s10 }
   0x4   :  { %p504_p1 = scmp.lt.u32.totalorder %s500_s13, %s711_s1 }
   0x6   :  { %p506_p2 = pnand %p504_p1, %p501_p0 }
   0x8   :  { %509 = shalt.err (!%p506_p2)
}
   0x9   :  { %s510_s18 = scalar_lea.vmem %s25_s10, 2048  ;;  %p515_p4 = scmp.lt.s32.totalorder %s25_s10, %s25_s10 }
   0xa   :  { %p511_p3 = scmp.ne.s32.totalorder %s25_s10, %s510_s18  ;;  %p516_p5 = scmp.lt.s32.totalorder %s510_s18, %s510_s18 }
   0xc   :  { %p517_p6 = por %p516_p5, %p515_p4 }
   0xe   :  { %p518_p7 = pnand %p517_p6, %p511_p3 }
  0x10   :  { %521 = shalt.err (!%p518_p7)
}
  0x11   :  { %s573_s19 = smov 128   ;;  %s574_s20 = smov 8  }
  0x12   :  { %30 = dma.hbm_to_vmem [thread:$0]  %s711_s1, 2048, %s25_s10, [#allocation3], %s573_s19, %s573_s19, %s574_s20  }
  0x13   :  { %s575_s23 = smov [#allocation5]   ;;  %s522_s27 = scalar_lea.hbm %s717_s7, 2048 }
  0x14   :  { %s46_s24 = sshll.u32 %s575_s23, 4  ;;  %p523_p8 = scmp.ne.s32.totalorder %s717_s7, %s522_s27  ;;  %s47_s24 = int_to_ptr.vmem [resolvable:$true] %s46_s24 }
  0x15   :  { %p526_p9 = scmp.lt.u32.totalorder %s522_s27, %s717_s7 }
  0x17   :  { %p528_p10 = pnand %p526_p9, %p523_p8 }
  0x19   :  { %531 = shalt.err (!%p528_p10)
}
  0x1a   :  { %s532_s12 = scalar_lea.vmem %s47_s24, 2048  ;;  %p537_p12 = scmp.lt.s32.totalorder %s47_s24, %s47_s24 }
  0x1b   :  { %p533_p11 = scmp.ne.s32.totalorder %s47_s24, %s532_s12  ;;  %p538_p13 = scmp.lt.s32.totalorder %s532_s12, %s532_s12 }
  0x1d   :  { %p539_p0 = por %p538_p13, %p537_p12 }
  0x1f   :  { %p540_p1 = pnand %p539_p0, %p533_p11 }
  0x21   :  { %543 = shalt.err (!%p540_p1)
}
  0x22   :  { %52 = dma.hbm_to_vmem [thread:$0]  %s717_s7, 2048, %s47_s24, [#allocation6], %s573_s19, %s573_s19, %s574_s20  }
  0x23   :  { %566 = dma.done.wait [#allocation3], 2048  }
  0x24   :  { %567 = vsyncadd [#allocation3], 4294965248 }
  0x25   :  { %568 = dma.done.wait [#allocation6], 2048  }
  0x26   :  { %569 = vsyncadd [#allocation6], 4294965248  ;;  %v657_v0 = vld [vmem:[%s710_s0] sm:$0xff]  ;;  %v95_v3 = vld [vmem:[#allocation2 + $0x8] sm:$0xff]  ;;  %v576_v5 = vmov 0.0|0.0   ;;  %vm577_vm0 = vmmov 0  }
  0x27   :  { %64 = vadd.xlane.f32.xlu0 %v657_v0  ;;  %v67_v1 = vmul.f32 %v657_v0, %v657_v0  ;;  %v94_v2 = vld [vmem:[#allocation2] sm:$0xff]  ;;  %440 = vmatprep.subr.bf16.mxu0 %v576_v5  ;;  %v96_v6 = vld [vmem:[#allocation2 + $0x10] sm:$0xff]  ;;  %v97_v7 = vld [vmem:[#allocation2 + $0x18] sm:$0xff]  ;;  %v578_v17 = vmov 0.0   ;;  %s579_s22 = smov [#allocation7]  }
  0x28   :  { %v441_v4 = vpack.c.bf16 %v95_v3, %v94_v2  ;;  %464 = vmatprep.subr.bf16.mxu1 %v576_v5  ;;  %v444_v8 = vpack.c.bf16 %v97_v7, %v96_v6  ;;  %v98_v9 = vld [vmem:[#allocation2 + $0x20] sm:$0xff]  ;;  %v99_v10 = vld [vmem:[#allocation2 + $0x28] sm:$0xff]  ;;  %v100_v12 = vld [vmem:[#allocation2 + $0x30] sm:$0xff]  ;;  %402 = vmatprep.mubr.msk.f32.mxu0 %vm577_vm0, %v578_v17  ;;  %s320_s23 = sshll.u32 %s579_s22, 4  ;;  %s321_s23 = int_to_ptr.vmem [resolvable:$true] %s320_s23 }
  0x29   :  { %v447_v11 = vpack.c.bf16 %v99_v10, %v98_v9  ;;  %v101_v13 = vld [vmem:[#allocation2 + $0x38] sm:$0xff]  ;;  %v102_v15 = vld [vmem:[#allocation2 + $0x40] sm:$0xff]  ;;  %v103_v16 = vld [vmem:[#allocation2 + $0x48] sm:$0xff]  ;;  %437 = vmatprep.mubr.msk.f32.mxu1 %vm577_vm0, %v578_v17  ;;  %p549_p3 = scmp.lt.s32.totalorder %s321_s23, %s321_s23 }
  0x2a   :  { %442 = vmatpush3.bf16.msra.mxu0 %v441_v4  ;;  %v450_v14 = vpack.c.bf16 %v101_v13, %v100_v12  ;;  %v453_v18 = vpack.c.bf16 %v103_v16, %v102_v15  ;;  %v104_v19 = vld [vmem:[#allocation2 + $0x50] sm:$0xff]  ;;  %v105_v20 = vld [vmem:[#allocation2 + $0x58] sm:$0xff]  ;;  %v106_v22 = vld [vmem:[#allocation2 + $0x60] sm:$0xff] }
  0x2b   :  { %68 = vadd.xlane.f32.xlu0 %v67_v1  ;;  %443 = vmatprep.subr.bf16.mxu0 %v576_v5  ;;  %v456_v21 = vpack.c.bf16 %v105_v20, %v104_v19  ;;  %v107_v23 = vld [vmem:[#allocation2 + $0x68] sm:$0xff]  ;;  %v108_v25 = vld [vmem:[#allocation2 + $0x70] sm:$0xff]  ;;  %v109_v26 = vld [vmem:[#allocation2 + $0x78] sm:$0xff] }
  0x2c   :  { %v459_v24 = vpack.c.bf16 %v107_v23, %v106_v22  ;;  %v462_v27 = vpack.c.bf16 %v109_v26, %v108_v25  ;;  %v330_v38 = vld [vmem:[%s713_s3] ss:$0 sm:$0xff]  ;;  %v220_v51 = vld [vmem:[#allocation5 + $0x8] sm:$0xff]  ;;  %v221_v53 = vld [vmem:[#allocation5 + $0x10] sm:$0xff] }
  0x2d   :  { %v331_v40 = vld [vmem:[%s714_s4] ss:$0 sm:$0xff]  ;;  %v222_v54 = vld [vmem:[#allocation5 + $0x18] sm:$0xff]  ;;  %v224_v57 = vld [vmem:[#allocation5 + $0x28] sm:$0xff] }
  0x2e   :  { %445 = vmatpush3.bf16.msra.mxu0 %v444_v8  ;;  %v332_v45 = vld [vmem:[%s712_s2] ss:$0 sm:$0xff]  ;;  %v468_v55 = vpack.c.bf16 %v222_v54, %v221_v53  ;;  %v225_v59 = vld [vmem:[#allocation5 + $0x30] sm:$0xff]  ;;  %v226_v60 = vld [vmem:[#allocation5 + $0x38] sm:$0xff] }
  0x2f   :  { %446 = vmatprep.subr.bf16.mxu0 %v576_v5  ;;  %v219_v50 = vld [vmem:[#allocation5] sm:$0xff]  ;;  %v474_v61 = vpack.c.bf16 %v226_v60, %v225_v59  ;;  %v228_v63 = vld [vmem:[#allocation5 + $0x48] sm:$0xff]  ;;  %v229_v2 = vld [vmem:[#allocation5 + $0x50] sm:$0xff] }
  0x30   :  { %v465_v52 = vpack.c.bf16 %v220_v51, %v219_v50  ;;  %v223_v56 = vld [vmem:[#allocation5 + $0x20] sm:$0xff]  ;;  %v230_v3 = vld [vmem:[#allocation5 + $0x58] sm:$0xff]  ;;  %v232_v7 = vld [vmem:[#allocation5 + $0x68] sm:$0xff] }
  0x31   :  { %v471_v58 = vpack.c.bf16 %v224_v57, %v223_v56  ;;  %v227_v62 = vld [vmem:[#allocation5 + $0x40] sm:$0xff]  ;;  %v480_v4 = vpack.c.bf16 %v230_v3, %v229_v2  ;;  %v233_v9 = vld [vmem:[#allocation5 + $0x70] sm:$0xff]  ;;  %v234_v10 = vld [vmem:[#allocation5 + $0x78] sm:$0xff] }
  0x32   :  { %448 = vmatpush3.bf16.msra.mxu0 %v447_v11  ;;  %466 = vmatpush3.bf16.msra.mxu1 %v465_v52  ;;  %v477_v1 = vpack.c.bf16 %v228_v63, %v227_v62  ;;  %v231_v6 = vld [vmem:[#allocation5 + $0x60] sm:$0xff]  ;;  %v486_v11 = vpack.c.bf16 %v234_v10, %v233_v9 }
  0x33   :  { %449 = vmatprep.subr.bf16.mxu0 %v576_v5  ;;  %467 = vmatprep.subr.bf16.mxu1 %v576_v5  ;;  %v483_v8 = vpack.c.bf16 %v232_v7, %v231_v6  ;;  %v333_v22 = vld [vmem:[%s715_s5] ss:$0 sm:$0xff]  ;;  %s544_s5 = scalar_lea.vmem %s321_s23, 128 }
  0x34   :  { %p545_p2 = scmp.ne.s32.totalorder %s321_s23, %s544_s5  ;;  %p550_p4 = scmp.lt.s32.totalorder %s544_s5, %s544_s5 }
  0x36   :  { %451 = vmatpush3.bf16.msra.mxu0 %v450_v14  ;;  %469 = vmatpush3.bf16.msra.mxu1 %v468_v55  ;;  %p551_p5 = por %p550_p4, %p549_p3 }
  0x37   :  { %452 = vmatprep.subr.bf16.mxu0 %v576_v5  ;;  %470 = vmatprep.subr.bf16.mxu1 %v576_v5 }
  0x38   :  { %p552_p6 = pnand %p551_p5, %p545_p2 }
  0x3a   :  { %454 = vmatpush3.bf16.msra.mxu0 %v453_v18  ;;  %472 = vmatpush3.bf16.msra.mxu1 %v471_v58 }
  0x3b   :  { %455 = vmatprep.subr.bf16.mxu0 %v576_v5  ;;  %473 = vmatprep.subr.bf16.mxu1 %v576_v5 }
  0x3e   :  { %457 = vmatpush3.bf16.msra.mxu0 %v456_v21  ;;  %475 = vmatpush3.bf16.msra.mxu1 %v474_v61 }
  0x3f   :  { %458 = vmatprep.subr.bf16.mxu0 %v576_v5  ;;  %476 = vmatprep.subr.bf16.mxu1 %v576_v5 }
  0x42   :  { %460 = vmatpush3.bf16.msra.mxu0 %v459_v24  ;;  %478 = vmatpush3.bf16.msra.mxu1 %v477_v1 }
  0x43   :  { %461 = vmatprep.subr.bf16.mxu0 %v576_v5  ;;  %479 = vmatprep.subr.bf16.mxu1 %v576_v5 }
  0x46   :  { %463 = vmatpush3.bf16.msra.mxu0 %v462_v27  ;;  %481 = vmatpush3.bf16.msra.mxu1 %v480_v4 }
  0x47   :  { %482 = vmatprep.subr.bf16.mxu1 %v576_v5 }
  0x4a   :  { %484 = vmatpush3.bf16.msra.mxu1 %v483_v8 }
  0x4b   :  { %485 = vmatprep.subr.bf16.mxu1 %v576_v5  ;;  %v334_v5 = vld [vmem:[%s716_s6] ss:$0 sm:$0xff] }
  0x4e   :  { %487 = vmatpush3.bf16.msra.mxu1 %v486_v11 }
  0xb4   :  { %v65_v28 = vpop.xlane.xlu0 %64 }
  0xb5   :  { %v66_v29 = vmul.f32 0.03125, %v65_v28  ;;  %v335_v28 = vld [vmem:[%s718_s8] ss:$0 sm:$0xff] }
  0xb7   :  { %v71_v31 = vmul.f32 %v66_v29, %v66_v29  ;;  %v76_v36 = vsub.f32 %v657_v0, %v66_v29 }
  0xb8   :  { %v69_v30 = vpop.xlane.xlu0 %68 }
  0xb9   :  { %v70_v32 = vmul.f32 0.03125, %v69_v30 }
  0xbb   :  { %v72_v33 = vsub.f32 %v70_v32, %v71_v31 }
  0xbd   :  { %v73_v34 = vmax.f32 %v72_v33, 0.0 }
  0xbf   :  { %v74_v35 = vadd.f32 1e-05, %v73_v34 }
  0xc1   :  { %496 = vrsqrt.f32 %v74_v35 }
  0xcb   :  { %v497_v37 = vpop.eup %496 }
  0xcc   :  { %v77_v39 = vmul.f32 %v497_v37, %v76_v36 }
  0xce   :  { %v84_v41 = vmul.f32 %v330_v38, %v77_v39 }
  0xd0   :  { %v91_v42 = vadd.f32 %v331_v40, %v84_v41 }
  0xd2   :  { %v92_v43 = vmul.f32 0.01, %v91_v42 }
  0xd4   :  { %v93_v44 = vmax.f32 %v91_v42, %v92_v43 }
  0xd6   :  { %403 = vmatmul.mubr.f32.vlgmr.msra.gmra.mrb[0].mxu0 %v93_v44 }
 0x1a9   :  { %v183_v46 = vpop.f32.mrb[0].mxu0 }
 0x1aa   :  { %v184_v47 = vadd.f32 %v332_v45, %v183_v46  ;;  %v404_v48 = vpop.f32.mrb[1].mxu0 }
 0x1ac   :  { %189 = vadd.xlane.f32.xlu1 %v184_v47  ;;  %v192_v49 = vmul.f32 %v184_v47, %v184_v47 }
 0x1b0   :  { %193 = vadd.xlane.f32.xlu1 %v192_v49 }
 0x239   :  { %v190_v12 = vpop.xlane.xlu1 %189 }
 0x23a   :  { %v191_v13 = vmul.f32 0.015625, %v190_v12 }
 0x23c   :  { %v196_v15 = vmul.f32 %v191_v13, %v191_v13  ;;  %v201_v20 = vsub.f32 %v184_v47, %v191_v13 }
 0x23d   :  { %v194_v14 = vpop.xlane.xlu1 %193 }
 0x23e   :  { %v195_v16 = vmul.f32 0.015625, %v194_v14 }
 0x240   :  { %v197_v17 = vsub.f32 %v195_v16, %v196_v15 }
 0x242   :  { %v198_v18 = vmax.f32 %v197_v17, 0.0 }
 0x244   :  { %v199_v19 = vadd.f32 1e-05, %v198_v18 }
 0x246   :  { %498 = vrsqrt.f32 %v199_v19 }
 0x250   :  { %v499_v21 = vpop.eup %498 }
 0x251   :  { %v202_v23 = vmul.f32 %v499_v21, %v201_v20 }
 0x253   :  { %v209_v24 = vmul.f32 %v333_v22, %v202_v23 }
 0x255   :  { %v216_v25 = vadd.f32 %v334_v5, %v209_v24 }
 0x257   :  { %v217_v26 = vmul.f32 0.01, %v216_v25 }
 0x259   :  { %v218_v27 = vmax.f32 %v216_v25, %v217_v26 }
 0x25b   :  { %438 = vmatmul.mubr.f32.vlgmr.msra.gmra.mrb[0].mxu1 %v218_v27 }
 0x32e   :  { %v308_v29 = vpop.f32.mrb[0].mxu1 }
 0x32f   :  { %v309_v30 = vadd.f32 %v335_v28, %v308_v29  ;;  %v439_v31 = vpop.f32.mrb[1].mxu1 }
 0x331   :  { %v312_v32 = vadd.f32 %v309_v30, %v657_v0 }
 0x333   :  { %313 = vst [vmem:[#allocation7] sm:$0xff] %v312_v32 }
 0x334   :  { %555 = shalt.err (!%p552_p6)
}
 0x335   :  { %s556_s8 = scalar_lea.hbm %s719_s9, 128 }
 0x336   :  { %p557_p7 = scmp.ne.s32.totalorder %s719_s9, %s556_s8  ;;  %p560_p8 = scmp.lt.u32.totalorder %s556_s8, %s719_s9 }
 0x338   :  { %p562_p9 = pnand %p560_p8, %p557_p7 }
 0x33a   :  { %565 = shalt.err (!%p562_p9)
}
 0x33b   :  { %323 = dma.vmem_to_hbm [thread:$0]  %s321_s23, 128, %s719_s9, [#allocation4]  }
 0x33c   :  { %570 = dma.done.wait [#allocation4], 128  }
 0x33d   :  { %571 = vsyncadd [#allocation4], 4294967168 }
 0x33e   :  { %327 = vsyncpa [#allocation3], 1 }
 0x33f   :  { %328 = vsyncpa [#allocation6], 1 }
 0x340   :  { %329 = vsyncpa [#allocation4], 1 }

</bundles_post_ra>
